<compile_context>
chip_gen: v7x
topology: tpu7x:2x2x1
jax: 0.10.0
libtpu: 0.0.40
codegen_flags: <defaults>
</compile_context>

<pallas_src>
import functools

import jax
import jax.numpy as jnp
from jax import lax
from jax.experimental import pallas as pl
from jax.experimental.pallas import tpu as pltpu


def _round_up(x, m):
    return ((x + m - 1) // m) * m


def _vmem_capacity_bytes():
    try:
        return int(pltpu.get_tpu_info().vmem_capacity_bytes)
    except Exception:
        return 64 * 1024 * 1024  # conservative: v7x per-TensorCore VMEM


def _bow_onehot_kernel(tile_b, seq_len, ids_ref, emb_ref, out_ref):
    """One MXU matmul per batch tile (small vocabularies).

    ids_ref: VMEM (seq_len*tile_b, 1) int32; row s*tile_b + r <-> (batch r, pos s)
    emb_ref: VMEM (V_pad, E_pad) table (grid-invariant, single-buffered)
    out_ref: VMEM (tile_b, E_pad)
    """
    rows = ids_ref.shape[0]
    v_pad = emb_ref.shape[0]
    lane = lax.broadcasted_iota(jnp.int32, (rows, v_pad), 1)
    onehot = (lane == ids_ref[...]).astype(emb_ref.dtype)          # VPU compare
    # (rows, V_pad) @ (V_pad, E_pad) on the MXU.  Default precision may round
    # f32 operands to bf16 inside the MXU; fine for [-0.1, 0.1] embeddings.
    emb = jnp.dot(onehot, emb_ref[...], preferred_element_type=jnp.float32)
    acc = emb[0:tile_b, :]
    for s in range(1, seq_len):             # static, 8-row-tile-aligned slices
        acc = jnp.maximum(acc, emb[s * tile_b:(s + 1) * tile_b, :])
    out_ref[...] = acc.astype(out_ref.dtype)


def _bow_gather_kernel(seq_len, ids_ref, emb_ref, out_ref):
    """Per-token dynamic row gather (large vocabularies).

    ids_ref: SMEM (B_pad*seq_len,) int32 (scalar prefetch), index b*seq_len + s
    emb_ref: VMEM (V_pad, E_pad) table (grid-invariant, single-buffered)
    out_ref: VMEM (tile_b, E_pad)
    """
    bt = pl.program_id(0)
    tile_b = out_ref.shape[0]

    def row_body(r, carry):
        base = (bt * tile_b + r) * seq_len
        acc0 = emb_ref[pl.ds(ids_ref[base], 1), :]        # (1, E_pad) VMEM gather

        def seq_body(s, acc):
            return jnp.maximum(acc, emb_ref[pl.ds(ids_ref[base + s], 1), :])

        row = lax.fori_loop(1, seq_len, seq_body, acc0,
                            unroll=min(8, max(seq_len - 1, 1)))
        out_ref[pl.ds(r, 1), :] = row                     # one row store per batch row
        return carry

    lax.fori_loop(0, tile_b, row_body, 0)


def bow_encoder(ids, emb_table, *, tile_b=None, force_path=None):
    """ids: [B, S] int, emb_table: [V, E] float -> [B, E] float (max over seq)."""
    B, S = ids.shape
    V, E = emb_table.shape
    if S < 1:
        raise ValueError("BOWEncoder requires seq_len >= 1 (MaxPool1d kernel_size=S).")

    dtype = emb_table.dtype
    itemsize = jnp.dtype(dtype).itemsize
    if tile_b is None:
        tile_b = 8 if itemsize >= 4 else 16       # f32 / bf16 sublane packing
        while tile_b < 64 and B >= 4 * tile_b:    # amortize per-grid-step overhead
            tile_b *= 2

    E_pad = _round_up(E, 128)                     # lane-dense loads/stores
    B_pad = _round_up(B, tile_b)
    num_tiles = B_pad // tile_b

    # One-hot matmul FLOPs scale with V: keep it for small vocabularies only.
    path = force_path or ("onehot" if V <= 2048 else "gather")
    V_pad = _round_up(V, 128 if path == "onehot" else 8)

    table = emb_table
    if (V_pad, E_pad) != (V, E):
        table = jnp.pad(table, ((0, V_pad - V), (0, E_pad - E)))

    ids = ids.astype(jnp.int32)
    if B_pad != B:
        ids = jnp.pad(ids, ((0, B_pad - B), (0, 0)))  # padded rows use token 0, sliced off below

    # ---- generation-aware scoped-VMEM sizing (table counted once) ------------
    vmem_cap = _vmem_capacity_bytes()
    table_bytes = V_pad * E_pad * itemsize
    out_bytes = 2 * tile_b * E_pad * itemsize          # double-buffered output tile
    if path == "onehot":
        work_bytes = 2 * S * tile_b * 4 + S * tile_b * (V_pad + E_pad) * 4
    else:
        work_bytes = B_pad * S * 4 + tile_b * E_pad * 4
    need = table_bytes + out_bytes + work_bytes + (2 << 20)
    if need > vmem_cap - 16 * 1024 * 1024:
        # TODO(synk): non-resident fallback (stream only referenced rows / chunk V
        # along an 'arbitrary' grid axis with a running max) for tables that do
        # not fit per-core VMEM (e.g. v7x 64 MiB/TC).
        raise NotImplementedError(
            f"embedding table needs ~{need} B of VMEM; only {vmem_cap} B available")
    vmem_limit = int(min(vmem_cap - 8 * 1024 * 1024,
                         max(need + (4 << 20), 32 * 1024 * 1024)))

    compiler_params = pltpu.CompilerParams(
        dimension_semantics=("parallel",), vmem_limit_bytes=vmem_limit)
    out_shape = jax.ShapeDtypeStruct((B_pad, E_pad), dtype)

    def call(table_mode):
        spec_kwargs = {} if table_mode is None else {"pipeline_mode": table_mode}
        if path == "onehot":
            # Reorder ids so each tile's block is contiguous and row s*TB + r maps
            # to (batch row r, seq pos s): static tile-aligned slices in-kernel.
            ids_col = (ids.reshape(num_tiles, tile_b, S)
                          .transpose(0, 2, 1)
                          .reshape(num_tiles * S * tile_b, 1))
            grid_spec = pltpu.PrefetchScalarGridSpec(
                num_scalar_prefetch=0,
                grid=(num_tiles,),
                in_specs=[
                    pl.BlockSpec((S * tile_b, 1), lambda bt: (bt, 0)),
                    pl.BlockSpec((V_pad, E_pad), lambda bt: (0, 0), **spec_kwargs),
                ],
                out_specs=pl.BlockSpec((tile_b, E_pad), lambda bt: (bt, 0)),
            )
            kernel = functools.partial(_bow_onehot_kernel, tile_b, S)
            return pl.pallas_call(kernel, out_shape=out_shape, grid_spec=grid_spec,
                                  compiler_params=compiler_params)(ids_col, table)
        else:
            ids_flat = ids.reshape(B_pad * S)   # 1-D scalar prefetch: no 2-D SMEM padding
            grid_spec = pltpu.PrefetchScalarGridSpec(
                num_scalar_prefetch=1,
                grid=(num_tiles,),
                in_specs=[
                    pl.BlockSpec((V_pad, E_pad), lambda bt, ids_s: (0, 0), **spec_kwargs),
                ],
                out_specs=pl.BlockSpec((tile_b, E_pad), lambda bt, ids_s: (bt, 0)),
            )
            kernel = functools.partial(_bow_gather_kernel, S)
            return pl.pallas_call(kernel, out_shape=out_shape, grid_spec=grid_spec,
                                  compiler_params=compiler_params)(ids_flat, table)

    try:
        out = call(pl.Buffered(1))   # single-buffer the grid-invariant table
    except Exception:                # pragma: no cover - pipeline_mode unsupported
        out = call(None)             # fall back to default double-buffering

    return out[:B, :E]


def init_bow_params(key, vocab_size, emb_size):
    # nn.init.uniform_(-0.1, 0.1); row 0 (padding id) forced to zero.
    w = jax.random.uniform(key, (vocab_size, emb_size),
                           minval=-0.1, maxval=0.1, dtype=jnp.float32)
    return w.at[0].set(0.0)


if __name__ == "__main__":
    vocab_size, emb_size, hidden_size = 50, 32, 32   # hidden_size unused in forward
    batch, seq_len = 2, 8

    key = jax.random.PRNGKey(0)
    k_emb, k_ids = jax.random.split(key)
    emb_table = init_bow_params(k_emb, vocab_size, emb_size)
    ids = jax.random.randint(k_ids, (batch, seq_len), 0, vocab_size, dtype=jnp.int32)

    # Pure-JAX reference (embedding gather + max over seq; dropout identity).
    ref = jnp.max(emb_table[ids], axis=1)

    out = jax.block_until_ready(bow_encoder(ids, emb_table))            # one-hot MXU path
    assert out.shape == (batch, emb_size)
    # MXU default precision may round f32 operands to bf16; tolerance covers it.
    assert jnp.allclose(out, ref, atol=2e-3), "one-hot path mismatch vs reference"

    out_g = jax.block_until_ready(bow_encoder(ids, emb_table, force_path="gather"))
    assert out_g.shape == (batch, emb_size)
    assert jnp.allclose(out_g, ref, atol=1e-6), "gather path mismatch vs reference"

    print("KERNEL_OK")
</pallas_src>

<mosaic_0001>
module attributes {stable_mosaic.version = 11 : i64} {
  func.func @_bow_onehot_kernel(%arg0: i32, %arg1: memref<64x1xi32, #tpu.memory_space<vmem>>, %arg2: memref<128x128xf32, #tpu.memory_space<vmem>>, %arg3: memref<8x128xf32, #tpu.memory_space<vmem>>) attributes {dimension_semantics = [#tpu.dimension_semantics<parallel>], iteration_bounds = array<i64: 1>, scalar_prefetch = 0 : i64, scratch_operands = 0 : i64, tpu.core_type = #tpu.core_type<tc>, window_params = [{transform_indices = @transform_0, window_bounds = array<i64: 64, 1>}, {pipeline_mode = #tpu.pipeline_mode<synchronous>, transform_indices = @transform_1, window_bounds = array<i64: 128, 128>}, {transform_indices = @transform_2, window_bounds = array<i64: 8, 128>}]} {
    %0 = tpu.iota {dimensions = array<i32: 1>} : vector<64x128xi32>
    %c0 = arith.constant 0 : index
    %c0_0 = arith.constant 0 : index
    %1 = vector.load %arg1[%c0, %c0_0] : memref<64x1xi32, #tpu.memory_space<vmem>>, vector<64x1xi32>
    %2 = vector.broadcast %1 : vector<64x1xi32> to vector<64x128xi32>
    %3 = arith.cmpi eq, %0, %2 : vector<64x128xi32>
    %4 = arith.extui %3 : vector<64x128xi1> to vector<64x128xi32>
    %5 = arith.sitofp %4 : vector<64x128xi32> to vector<64x128xf32>
    %c0_1 = arith.constant 0 : index
    %c0_2 = arith.constant 0 : index
    %6 = vector.load %arg2[%c0_1, %c0_2] : memref<128x128xf32, #tpu.memory_space<vmem>>, vector<128x128xf32>
    %cst = arith.constant dense<0.000000e+00> : vector<64x128xf32>
    %7 = tpu.matmul %5, %6, %cst {dimension_numbers = #tpu.dot_dimension_numbers<[1], [0], [0], [1], [0, 0, 1, 1], [], []>} : vector<64x128xf32>, vector<128x128xf32>, vector<64x128xf32> -> vector<64x128xf32>
    %8 = vector.extract_strided_slice %7 {offsets = [0, 0], sizes = [8, 128], strides = [1, 1]} : vector<64x128xf32> to vector<8x128xf32>
    %9 = vector.extract_strided_slice %7 {offsets = [8, 0], sizes = [8, 128], strides = [1, 1]} : vector<64x128xf32> to vector<8x128xf32>
    %10 = arith.maximumf %8, %9 : vector<8x128xf32>
    %11 = vector.extract_strided_slice %7 {offsets = [16, 0], sizes = [8, 128], strides = [1, 1]} : vector<64x128xf32> to vector<8x128xf32>
    %12 = arith.maximumf %10, %11 : vector<8x128xf32>
    %13 = vector.extract_strided_slice %7 {offsets = [24, 0], sizes = [8, 128], strides = [1, 1]} : vector<64x128xf32> to vector<8x128xf32>
    %14 = arith.maximumf %12, %13 : vector<8x128xf32>
    %15 = vector.extract_strided_slice %7 {offsets = [32, 0], sizes = [8, 128], strides = [1, 1]} : vector<64x128xf32> to vector<8x128xf32>
    %16 = arith.maximumf %14, %15 : vector<8x128xf32>
    %17 = vector.extract_strided_slice %7 {offsets = [40, 0], sizes = [8, 128], strides = [1, 1]} : vector<64x128xf32> to vector<8x128xf32>
    %18 = arith.maximumf %16, %17 : vector<8x128xf32>
    %19 = vector.extract_strided_slice %7 {offsets = [48, 0], sizes = [8, 128], strides = [1, 1]} : vector<64x128xf32> to vector<8x128xf32>
    %20 = arith.maximumf %18, %19 : vector<8x128xf32>
    %21 = vector.extract_strided_slice %7 {offsets = [56, 0], sizes = [8, 128], strides = [1, 1]} : vector<64x128xf32> to vector<8x128xf32>
    %22 = arith.maximumf %20, %21 : vector<8x128xf32>
    %c0_3 = arith.constant 0 : index
    %c0_4 = arith.constant 0 : index
    %23 = vector.load %arg3[%c0_3, %c0_4] : memref<8x128xf32, #tpu.memory_space<vmem>>, vector<8x128xf32>
    tpu.vector_store %arg3[%c0_3, %c0_4], %22 {strides = array<i32>} : memref<8x128xf32, #tpu.memory_space<vmem>>, vector<8x128xf32>,
    return
  }
  func.func @transform_0(%arg0: i32) -> (i32, i32) {
    %c0_i32 = arith.constant 0 : i32
    %c0_i32_0 = arith.constant 0 : i32
    return %arg0, %c0_i32 : i32, i32
  }
  func.func @transform_1(%arg0: i32) -> (i32, i32) {
    %c0_i32 = arith.constant 0 : i32
    %c0_i32_0 = arith.constant 0 : i32
    %c0_i32_1 = arith.constant 0 : i32
    return %c0_i32, %c0_i32_0 : i32, i32
  }
  func.func @transform_2(%arg0: i32) -> (i32, i32) {
    %c0_i32 = arith.constant 0 : i32
    %c0_i32_0 = arith.constant 0 : i32
    return %arg0, %c0_i32 : i32, i32
  }
}

module attributes {stable_mosaic.version = 11 : i64} {
  func.func @_bow_onehot_kernel(%arg0: i32, %arg1: memref<64x1xi32, #tpu.memory_space<vmem>>, %arg2: memref<128x128xf32, #tpu.memory_space<vmem>>, %arg3: memref<8x128xf32, #tpu.memory_space<vmem>>) attributes {dimension_semantics = [#tpu.dimension_semantics<parallel>], iteration_bounds = array<i64: 1>, scalar_prefetch = 0 : i64, scratch_operands = 0 : i64, tpu.core_type = #tpu.core_type<tc>, window_params = [{transform_indices = @transform_0, window_bounds = array<i64: 64, 1>}, {pipeline_mode = #tpu.pipeline_mode<synchronous>, transform_indices = @transform_1, window_bounds = array<i64: 128, 128>}, {transform_indices = @transform_2, window_bounds = array<i64: 8, 128>}]} {
    %0 = tpu.iota {dimensions = array<i32: 1>} : vector<64x128xi32>
    %c0 = arith.constant 0 : index
    %c0_0 = arith.constant 0 : index
    %1 = vector.load %arg1[%c0, %c0_0] : memref<64x1xi32, #tpu.memory_space<vmem>>, vector<64x1xi32>
    %2 = vector.broadcast %1 : vector<64x1xi32> to vector<64x128xi32>
    %3 = arith.cmpi eq, %0, %2 : vector<64x128xi32>
    %4 = arith.extui %3 : vector<64x128xi1> to vector<64x128xi32>
    %5 = arith.sitofp %4 : vector<64x128xi32> to vector<64x128xf32>
    %c0_1 = arith.constant 0 : index
    %c0_2 = arith.constant 0 : index
    %6 = vector.load %arg2[%c0_1, %c0_2] : memref<128x128xf32, #tpu.memory_space<vmem>>, vector<128x128xf32>
    %cst = arith.constant dense<0.000000e+00> : vector<64x128xf32>
    %7 = tpu.matmul %5, %6, %cst {dimension_numbers = #tpu.dot_dimension_numbers<[1], [0], [0], [1], [0, 0, 1, 1], [], []>} : vector<64x128xf32>, vector<128x128xf32>, vector<64x128xf32> -> vector<64x128xf32>
    %8 = vector.extract_strided_slice %7 {offsets = [0, 0], sizes = [8, 128], strides = [1, 1]} : vector<64x128xf32> to vector<8x128xf32>
    %9 = vector.extract_strided_slice %7 {offsets = [8, 0], sizes = [8, 128], strides = [1, 1]} : vector<64x128xf32> to vector<8x128xf32>
    %10 = arith.maximumf %8, %9 : vector<8x128xf32>
    %11 = vector.extract_strided_slice %7 {offsets = [16, 0], sizes = [8, 128], strides = [1, 1]} : vector<64x128xf32> to vector<8x128xf32>
    %12 = arith.maximumf %10, %11 : vector<8x128xf32>
    %13 = vector.extract_strided_slice %7 {offsets = [24, 0], sizes = [8, 128], strides = [1, 1]} : vector<64x128xf32> to vector<8x128xf32>
    %14 = arith.maximumf %12, %13 : vector<8x128xf32>
    %15 = vector.extract_strided_slice %7 {offsets = [32, 0], sizes = [8, 128], strides = [1, 1]} : vector<64x128xf32> to vector<8x128xf32>
    %16 = arith.maximumf %14, %15 : vector<8x128xf32>
    %17 = vector.extract_strided_slice %7 {offsets = [40, 0], sizes = [8, 128], strides = [1, 1]} : vector<64x128xf32> to vector<8x128xf32>
    %18 = arith.maximumf %16, %17 : vector<8x128xf32>
    %19 = vector.extract_strided_slice %7 {offsets = [48, 0], sizes = [8, 128], strides = [1, 1]} : vector<64x128xf32> to vector<8x128xf32>
    %20 = arith.maximumf %18, %19 : vector<8x128xf32>
    %21 = vector.extract_strided_slice %7 {offsets = [56, 0], sizes = [8, 128], strides = [1, 1]} : vector<64x128xf32> to vector<8x128xf32>
    %22 = arith.maximumf %20, %21 : vector<8x128xf32>
    %c0_3 = arith.constant 0 : index
    %c0_4 = arith.constant 0 : index
    %23 = vector.load %arg3[%c0_3, %c0_4] : memref<8x128xf32, #tpu.memory_space<vmem>>, vector<8x128xf32>
    tpu.vector_store %arg3[%c0_3, %c0_4], %22 {strides = array<i32>} : memref<8x128xf32, #tpu.memory_space<vmem>>, vector<8x128xf32>,
    return
  }
  func.func @transform_0(%arg0: i32) -> (i32, i32) {
    %c0_i32 = arith.constant 0 : i32
    %c0_i32_0 = arith.constant 0 : i32
    return %arg0, %c0_i32 : i32, i32
  }
  func.func @transform_1(%arg0: i32) -> (i32, i32) {
    %c0_i32 = arith.constant 0 : i32
    %c0_i32_0 = arith.constant 0 : i32
    %c0_i32_1 = arith.constant 0 : i32
    return %c0_i32, %c0_i32_0 : i32, i32
  }
  func.func @transform_2(%arg0: i32) -> (i32, i32) {
    %c0_i32 = arith.constant 0 : i32
    %c0_i32_0 = arith.constant 0 : i32
    return %arg0, %c0_i32 : i32, i32
  }
}

</mosaic_0001>

<bundles_post_ra>
// kernel: tpu_custom_call.1
= control target key start
LH: loop header
LB: loop body
LE: loop exit
PB: predicated region body
PF: predicated region fallthrough
CT: control target
= control target key end

     0   :  { %7 = vsyncpa [#allocation3], 0  ;;  %s485_s0 = inlined_call_operand.vmem [shape: s32[64,1], index: 0, kind: input, shape index: {}]   ;;  %s486_s1 = inlined_call_operand.hbm [shape: f32[128,128], index: 1, kind: input, shape index: {}]   ;;  %s487_s2 = inlined_call_operand.hbm [shape: f32[8,128], index: 2, kind: output, shape index: {}]  }
   0x1   :  { %8 = vsyncpa [#allocation4], 0  ;;  %s416_s9 = smov [#allocation2]   ;;  %s368_s13 = scalar_lea.hbm %s486_s1, 2048 }
   0x2   :  { %s16_s10 = sshll.u32 %s416_s9, 4  ;;  %p369_p0 = scmp.ne.s32.totalorder %s486_s1, %s368_s13  ;;  %s17_s10 = int_to_ptr.vmem [resolvable:$true] %s16_s10 }
   0x3   :  { %p372_p1 = scmp.lt.u32.totalorder %s368_s13, %s486_s1 }
   0x5   :  { %p374_p2 = pnand %p372_p1, %p369_p0 }
   0x7   :  { %377 = shalt.err (!%p374_p2)
}
   0x8   :  { %s378_s18 = scalar_lea.vmem %s17_s10, 2048  ;;  %p383_p4 = scmp.lt.s32.totalorder %s17_s10, %s17_s10 }
   0x9   :  { %p379_p3 = scmp.ne.s32.totalorder %s17_s10, %s378_s18  ;;  %p384_p5 = scmp.lt.s32.totalorder %s378_s18, %s378_s18 }
   0xb   :  { %p385_p6 = por %p384_p5, %p383_p4 }
   0xd   :  { %p386_p7 = pnand %p385_p6, %p379_p3 }
   0xf   :  { %389 = shalt.err (!%p386_p7)
}
  0x10   :  { %s417_s19 = smov 128   ;;  %s418_s20 = smov 8  }
  0x11   :  { %22 = dma.hbm_to_vmem [thread:$0]  %s486_s1, 2048, %s17_s10, [#allocation3], %s417_s19, %s417_s19, %s418_s20  }
  0x12   :  { %412 = dma.done.wait [#allocation3], 2048  }
  0x13   :  { %413 = vsyncadd [#allocation3], 4294965248  ;;  %v419_v0 = vmov 0   ;;  %v30_v1 = vld [vmem:[%s485_s0 + $0x10] sm:$0xff]  ;;  %v28_v2 = vld [vmem:[%s485_s0] sm:$0xff]  ;;  %v26_v33 = vlaneseq  ;;  %v420_v37 = vmov 1.0  }
  0x14   :  { %367 = vset.pattern.permute.xlu1 %v419_v0  ;;  %366 = vset.pattern.permute.xlu0 %v419_v0  ;;  %v31_v3 = vld [vmem:[%s485_s0 + $0x18] sm:$0xff]  ;;  %v29_v4 = vld [vmem:[%s485_s0 + $0x8] sm:$0xff]  ;;  %v84_v5 = vld [vmem:[#allocation2] sm:$0xff] }
  0x15   :  { %43 = vperm.xlu1 %367, %v30_v1   ;;  %37 = vperm.xlu0 %366, %v28_v2   ;;  %v85_v6 = vld [vmem:[#allocation2 + $0x8] sm:$0xff]  ;;  %v86_v7 = vld [vmem:[#allocation2 + $0x10] sm:$0xff]  ;;  %v87_v8 = vld [vmem:[#allocation2 + $0x18] sm:$0xff]  ;;  %v27_v34 = vand.u32 127, %v26_v33 }
  0x16   :  { %v312_v9 = vpack.c.bf16 %v85_v6, %v84_v5  ;;  %v316_v10 = vpack.c.bf16 %v87_v8, %v86_v7  ;;  %v88_v11 = vld [vmem:[#allocation2 + $0x20] sm:$0xff]  ;;  %v89_v12 = vld [vmem:[#allocation2 + $0x28] sm:$0xff]  ;;  %v90_v16 = vld [vmem:[#allocation2 + $0x30] sm:$0xff] }
  0x17   :  { %v33_v13 = vld [vmem:[%s485_s0 + $0x28] sm:$0xff]  ;;  %v32_v14 = vld [vmem:[%s485_s0 + $0x20] sm:$0xff]  ;;  %v320_v15 = vpack.c.bf16 %v89_v12, %v88_v11  ;;  %v91_v17 = vld [vmem:[#allocation2 + $0x38] sm:$0xff] }
  0x18   :  { %313 = vmatprep.subr.bf16.mxu0 %v312_v9  ;;  %344 = vmatprep.subr.bf16.mxu1 %v312_v9  ;;  %v35_v18 = vld [vmem:[%s485_s0 + $0x38] sm:$0xff]  ;;  %v34_v19 = vld [vmem:[%s485_s0 + $0x30] sm:$0xff]  ;;  %v324_v20 = vpack.c.bf16 %v91_v17, %v90_v16  ;;  %v92_v21 = vld [vmem:[#allocation2 + $0x40] sm:$0xff]  ;;  %s421_s0 = smov [#allocation5]  }
  0x19   :  { %46 = vperm.xlu1 %367, %v31_v3   ;;  %40 = vperm.xlu0 %366, %v29_v4   ;;  %v93_v22 = vld [vmem:[#allocation2 + $0x48] sm:$0xff]  ;;  %v94_v24 = vld [vmem:[#allocation2 + $0x50] sm:$0xff]  ;;  %v95_v25 = vld [vmem:[#allocation2 + $0x58] sm:$0xff]  ;;  %s219_s10 = sshll.u32 %s421_s0, 4  ;;  %s220_s10 = int_to_ptr.vmem [resolvable:$true] %s219_s10 }
  0x1a   :  { %315 = vmatpush3.bf16.msra.mxu0 %v312_v9  ;;  %352 = vmatpush3.bf16.msra.mxu1 %v312_v9  ;;  %v328_v23 = vpack.c.bf16 %v93_v22, %v92_v21  ;;  %v332_v26 = vpack.c.bf16 %v95_v25, %v94_v24  ;;  %v96_v27 = vld [vmem:[#allocation2 + $0x60] sm:$0xff]  ;;  %v97_v28 = vld [vmem:[#allocation2 + $0x68] sm:$0xff]  ;;  %v98_v30 = vld [vmem:[#allocation2 + $0x70] sm:$0xff]  ;;  %s390_s11 = scalar_lea.vmem %s220_s10, 128  ;;  %p395_p9 = scmp.lt.s32.totalorder %s220_s10, %s220_s10 }
  0x1b   :  { %317 = vmatprep.subr.bf16.mxu0 %v316_v10  ;;  %345 = vmatprep.subr.bf16.mxu1 %v316_v10  ;;  %v336_v29 = vpack.c.bf16 %v97_v28, %v96_v27  ;;  %v99_v31 = vld [vmem:[#allocation2 + $0x78] sm:$0xff]  ;;  %p391_p8 = scmp.ne.s32.totalorder %s220_s10, %s390_s11  ;;  %p396_p10 = scmp.lt.s32.totalorder %s390_s11, %s390_s11 }
  0x1c   :  { %v340_v32 = vpack.c.bf16 %v99_v31, %v98_v30 }
  0x1d   :  { %52 = vperm.xlu1 %367, %v33_v13   ;;  %49 = vperm.xlu0 %366, %v32_v14   ;;  %p397_p11 = por %p396_p10, %p395_p9 }
  0x1e   :  { %319 = vmatpush3.bf16.msra.mxu0 %v316_v10  ;;  %353 = vmatpush3.bf16.msra.mxu1 %v316_v10 }
  0x1f   :  { %321 = vmatprep.subr.bf16.mxu0 %v320_v15  ;;  %346 = vmatprep.subr.bf16.mxu1 %v320_v15  ;;  %p398_p12 = pnand %p397_p11, %p391_p8 }
  0x21   :  { %58 = vperm.xlu1 %367, %v35_v18   ;;  %55 = vperm.xlu0 %366, %v34_v19  }
  0x22   :  { %323 = vmatpush3.bf16.msra.mxu0 %v320_v15  ;;  %354 = vmatpush3.bf16.msra.mxu1 %v320_v15 }
  0x23   :  { %325 = vmatprep.subr.bf16.mxu0 %v324_v20  ;;  %347 = vmatprep.subr.bf16.mxu1 %v324_v20 }
  0x26   :  { %327 = vmatpush3.bf16.msra.mxu0 %v324_v20  ;;  %355 = vmatpush3.bf16.msra.mxu1 %v324_v20 }
  0x27   :  { %329 = vmatprep.subr.bf16.mxu0 %v328_v23  ;;  %348 = vmatprep.subr.bf16.mxu1 %v328_v23 }
  0x2a   :  { %331 = vmatpush3.bf16.msra.mxu0 %v328_v23  ;;  %356 = vmatpush3.bf16.msra.mxu1 %v328_v23 }
  0x2b   :  { %333 = vmatprep.subr.bf16.mxu0 %v332_v26  ;;  %349 = vmatprep.subr.bf16.mxu1 %v332_v26 }
  0x2e   :  { %335 = vmatpush3.bf16.msra.mxu0 %v332_v26  ;;  %357 = vmatpush3.bf16.msra.mxu1 %v332_v26 }
  0x2f   :  { %337 = vmatprep.subr.bf16.mxu0 %v336_v29  ;;  %350 = vmatprep.subr.bf16.mxu1 %v336_v29 }
  0x32   :  { %339 = vmatpush3.bf16.msra.mxu0 %v336_v29  ;;  %358 = vmatpush3.bf16.msra.mxu1 %v336_v29 }
  0x33   :  { %341 = vmatprep.subr.bf16.mxu0 %v340_v32  ;;  %351 = vmatprep.subr.bf16.mxu1 %v340_v32 }
  0x36   :  { %343 = vmatpush3.bf16.msra.mxu0 %v340_v32  ;;  %359 = vmatpush3.bf16.msra.mxu1 %v340_v32 }
  0x94   :  { %v44_v35 = vpop.permute.xlu1 %43  ;;  %v38_v36 = vpop.permute.xlu0 %37 }
  0x95   :  { %vm60_vm0 = vcmp.eq.s32.totalorder %v27_v34, %v38_v36  ;;  %vm62_vm1 = vcmp.eq.s32.totalorder %v27_v34, %v44_v35 }
  0x96   :  { %300 = vmatprep.mubr.msk.f32.mxu0 %vm60_vm0, %v420_v37 }
  0x98   :  { %v47_v38 = vpop.permute.xlu1 %46  ;;  %v41_v39 = vpop.permute.xlu0 %40 }
  0x99   :  { %vm61_vm2 = vcmp.eq.s32.totalorder %v27_v34, %v41_v39  ;;  %vm63_vm3 = vcmp.eq.s32.totalorder %v27_v34, %v47_v38 }
  0x9a   :  { %301 = vmatmul.mubr.msk.f32.vlgmr.msra.gmra.mrb[0].mxu0 %vm61_vm2, %v420_v37 }
  0x9b   :  { %303 = vmatprep.mubr.msk.f32.mxu0 %vm62_vm1, %v420_v37 }
  0x9c   :  { %v53_v40 = vpop.permute.xlu1 %52  ;;  %v50_v41 = vpop.permute.xlu0 %49 }
  0x9d   :  { %vm65_vm4 = vcmp.eq.s32.totalorder %v27_v34, %v53_v40  ;;  %vm64_vm5 = vcmp.eq.s32.totalorder %v27_v34, %v50_v41 }
  0x9e   :  { %304 = vmatmul.mubr.msk.f32.gmra.mrb[2].mxu0 %vm63_vm3, %v420_v37  ;;  %306 = vmatprep.mubr.msk.f32.mxu1 %vm64_vm5, %v420_v37 }
  0x9f   :  { %307 = vmatmul.mubr.msk.f32.vlgmr.msra.gmra.mrb[0].mxu1 %vm65_vm4, %v420_v37 }
  0xa0   :  { %v59_v42 = vpop.permute.xlu1 %58  ;;  %v56_v43 = vpop.permute.xlu0 %55 }
  0xa1   :  { %vm67_vm6 = vcmp.eq.s32.totalorder %v27_v34, %v59_v42  ;;  %vm66_vm7 = vcmp.eq.s32.totalorder %v27_v34, %v56_v43 }
  0xa2   :  { %309 = vmatprep.mubr.msk.f32.mxu1 %vm66_vm7, %v420_v37 }
  0xa3   :  { %310 = vmatmul.mubr.msk.f32.gmra.mrb[2].mxu1 %vm67_vm6, %v420_v37 }
 0x16d   :  { %v302_v44 = vpop.f32.mrb[0].mxu0 }
 0x16e   :  { %v166_v45 = vpop.f32.mrb[1].mxu0 }
 0x16f   :  { %v205_v46 = vmax.f32 %v166_v45, %v302_v44 }
 0x171   :  { %v305_v47 = vpop.f32.mrb[2].mxu0 }
 0x172   :  { %v176_v48 = vpop.f32.mrb[3].mxu0  ;;  %v308_v49 = vpop.f32.mrb[0].mxu1 }
 0x173   :  { %v206_v50 = vmax.f32 %v205_v46, %v176_v48  ;;  %v186_v51 = vpop.f32.mrb[1].mxu1 }
 0x175   :  { %v207_v52 = vmax.f32 %v206_v50, %v305_v47 }
 0x176   :  { %v311_v53 = vpop.f32.mrb[2].mxu1 }
 0x177   :  { %v208_v54 = vmax.f32 %v207_v52, %v186_v51  ;;  %v196_v55 = vpop.f32.mrb[3].mxu1 }
 0x179   :  { %v209_v56 = vmax.f32 %v208_v54, %v308_v49 }
 0x17b   :  { %v210_v57 = vmax.f32 %v209_v56, %v196_v55 }
 0x17d   :  { %v211_v58 = vmax.f32 %v210_v57, %v311_v53 }
 0x17f   :  { %212 = vst [vmem:[#allocation5] sm:$0xff] %v211_v58 }
 0x180   :  { %401 = shalt.err (!%p398_p12)
}
 0x181   :  { %s402_s14 = scalar_lea.hbm %s487_s2, 128 }
 0x182   :  { %p403_p13 = scmp.ne.s32.totalorder %s487_s2, %s402_s14  ;;  %p406_p0 = scmp.lt.u32.totalorder %s402_s14, %s487_s2 }
 0x184   :  { %p408_p1 = pnand %p406_p0, %p403_p13 }
 0x186   :  { %411 = shalt.err (!%p408_p1)
}
 0x187   :  { %222 = dma.vmem_to_hbm [thread:$0]  %s220_s10, 128, %s487_s2, [#allocation4]  }
 0x188   :  { %414 = dma.done.wait [#allocation4], 128  }
 0x189   :  { %415 = vsyncadd [#allocation4], 4294967168 }
 0x18a   :  { %226 = vsyncpa [#allocation3], 1 }
 0x18b   :  { %227 = vsyncpa [#allocation4], 1 }

// kernel: tpu_custom_call.1
= control target key start
LH: loop header
LB: loop body
LE: loop exit
PB: predicated region body
PF: predicated region fallthrough
CT: control target
= control target key end

     0   :  { %7 = vsyncpa [#allocation3], 0  ;;  %s485_s0 = inlined_call_operand.vmem [shape: s32[64,1], index: 0, kind: input, shape index: {}]   ;;  %s486_s1 = inlined_call_operand.hbm [shape: f32[128,128], index: 1, kind: input, shape index: {}]   ;;  %s487_s2 = inlined_call_operand.hbm [shape: f32[8,128], index: 2, kind: output, shape index: {}]  }
   0x1   :  { %8 = vsyncpa [#allocation4], 0  ;;  %s416_s9 = smov [#allocation2]   ;;  %s368_s13 = scalar_lea.hbm %s486_s1, 2048 }
   0x2   :  { %s16_s10 = sshll.u32 %s416_s9, 4  ;;  %p369_p0 = scmp.ne.s32.totalorder %s486_s1, %s368_s13  ;;  %s17_s10 = int_to_ptr.vmem [resolvable:$true] %s16_s10 }
   0x3   :  { %p372_p1 = scmp.lt.u32.totalorder %s368_s13, %s486_s1 }
   0x5   :  { %p374_p2 = pnand %p372_p1, %p369_p0 }
   0x7   :  { %377 = shalt.err (!%p374_p2)
}
   0x8   :  { %s378_s18 = scalar_lea.vmem %s17_s10, 2048  ;;  %p383_p4 = scmp.lt.s32.totalorder %s17_s10, %s17_s10 }
   0x9   :  { %p379_p3 = scmp.ne.s32.totalorder %s17_s10, %s378_s18  ;;  %p384_p5 = scmp.lt.s32.totalorder %s378_s18, %s378_s18 }
   0xb   :  { %p385_p6 = por %p384_p5, %p383_p4 }
   0xd   :  { %p386_p7 = pnand %p385_p6, %p379_p3 }
   0xf   :  { %389 = shalt.err (!%p386_p7)
}
  0x10   :  { %s417_s19 = smov 128   ;;  %s418_s20 = smov 8  }
  0x11   :  { %22 = dma.hbm_to_vmem [thread:$0]  %s486_s1, 2048, %s17_s10, [#allocation3], %s417_s19, %s417_s19, %s418_s20  }
  0x12   :  { %412 = dma.done.wait [#allocation3], 2048  }
  0x13   :  { %413 = vsyncadd [#allocation3], 4294965248  ;;  %v419_v0 = vmov 0   ;;  %v30_v1 = vld [vmem:[%s485_s0 + $0x10] sm:$0xff]  ;;  %v28_v2 = vld [vmem:[%s485_s0] sm:$0xff]  ;;  %v26_v33 = vlaneseq  ;;  %v420_v37 = vmov 1.0  }
  0x14   :  { %367 = vset.pattern.permute.xlu1 %v419_v0  ;;  %366 = vset.pattern.permute.xlu0 %v419_v0  ;;  %v31_v3 = vld [vmem:[%s485_s0 + $0x18] sm:$0xff]  ;;  %v29_v4 = vld [vmem:[%s485_s0 + $0x8] sm:$0xff]  ;;  %v84_v5 = vld [vmem:[#allocation2] sm:$0xff] }
  0x15   :  { %43 = vperm.xlu1 %367, %v30_v1   ;;  %37 = vperm.xlu0 %366, %v28_v2   ;;  %v85_v6 = vld [vmem:[#allocation2 + $0x8] sm:$0xff]  ;;  %v86_v7 = vld [vmem:[#allocation2 + $0x10] sm:$0xff]  ;;  %v87_v8 = vld [vmem:[#allocation2 + $0x18] sm:$0xff]  ;;  %v27_v34 = vand.u32 127, %v26_v33 }
  0x16   :  { %v312_v9 = vpack.c.bf16 %v85_v6, %v84_v5  ;;  %v316_v10 = vpack.c.bf16 %v87_v8, %v86_v7  ;;  %v88_v11 = vld [vmem:[#allocation2 + $0x20] sm:$0xff]  ;;  %v89_v12 = vld [vmem:[#allocation2 + $0x28] sm:$0xff]  ;;  %v90_v16 = vld [vmem:[#allocation2 + $0x30] sm:$0xff] }
  0x17   :  { %v33_v13 = vld [vmem:[%s485_s0 + $0x28] sm:$0xff]  ;;  %v32_v14 = vld [vmem:[%s485_s0 + $0x20] sm:$0xff]  ;;  %v320_v15 = vpack.c.bf16 %v89_v12, %v88_v11  ;;  %v91_v17 = vld [vmem:[#allocation2 + $0x38] sm:$0xff] }
  0x18   :  { %313 = vmatprep.subr.bf16.mxu0 %v312_v9  ;;  %344 = vmatprep.subr.bf16.mxu1 %v312_v9  ;;  %v35_v18 = vld [vmem:[%s485_s0 + $0x38] sm:$0xff]  ;;  %v34_v19 = vld [vmem:[%s485_s0 + $0x30] sm:$0xff]  ;;  %v324_v20 = vpack.c.bf16 %v91_v17, %v90_v16  ;;  %v92_v21 = vld [vmem:[#allocation2 + $0x40] sm:$0xff]  ;;  %s421_s0 = smov [#allocation5]  }
  0x19   :  { %46 = vperm.xlu1 %367, %v31_v3   ;;  %40 = vperm.xlu0 %366, %v29_v4   ;;  %v93_v22 = vld [vmem:[#allocation2 + $0x48] sm:$0xff]  ;;  %v94_v24 = vld [vmem:[#allocation2 + $0x50] sm:$0xff]  ;;  %v95_v25 = vld [vmem:[#allocation2 + $0x58] sm:$0xff]  ;;  %s219_s10 = sshll.u32 %s421_s0, 4  ;;  %s220_s10 = int_to_ptr.vmem [resolvable:$true] %s219_s10 }
  0x1a   :  { %315 = vmatpush3.bf16.msra.mxu0 %v312_v9  ;;  %352 = vmatpush3.bf16.msra.mxu1 %v312_v9  ;;  %v328_v23 = vpack.c.bf16 %v93_v22, %v92_v21  ;;  %v332_v26 = vpack.c.bf16 %v95_v25, %v94_v24  ;;  %v96_v27 = vld [vmem:[#allocation2 + $0x60] sm:$0xff]  ;;  %v97_v28 = vld [vmem:[#allocation2 + $0x68] sm:$0xff]  ;;  %v98_v30 = vld [vmem:[#allocation2 + $0x70] sm:$0xff]  ;;  %s390_s11 = scalar_lea.vmem %s220_s10, 128  ;;  %p395_p9 = scmp.lt.s32.totalorder %s220_s10, %s220_s10 }
  0x1b   :  { %317 = vmatprep.subr.bf16.mxu0 %v316_v10  ;;  %345 = vmatprep.subr.bf16.mxu1 %v316_v10  ;;  %v336_v29 = vpack.c.bf16 %v97_v28, %v96_v27  ;;  %v99_v31 = vld [vmem:[#allocation2 + $0x78] sm:$0xff]  ;;  %p391_p8 = scmp.ne.s32.totalorder %s220_s10, %s390_s11  ;;  %p396_p10 = scmp.lt.s32.totalorder %s390_s11, %s390_s11 }
  0x1c   :  { %v340_v32 = vpack.c.bf16 %v99_v31, %v98_v30 }
  0x1d   :  { %52 = vperm.xlu1 %367, %v33_v13   ;;  %49 = vperm.xlu0 %366, %v32_v14   ;;  %p397_p11 = por %p396_p10, %p395_p9 }
  0x1e   :  { %319 = vmatpush3.bf16.msra.mxu0 %v316_v10  ;;  %353 = vmatpush3.bf16.msra.mxu1 %v316_v10 }
  0x1f   :  { %321 = vmatprep.subr.bf16.mxu0 %v320_v15  ;;  %346 = vmatprep.subr.bf16.mxu1 %v320_v15  ;;  %p398_p12 = pnand %p397_p11, %p391_p8 }
  0x21   :  { %58 = vperm.xlu1 %367, %v35_v18   ;;  %55 = vperm.xlu0 %366, %v34_v19  }
  0x22   :  { %323 = vmatpush3.bf16.msra.mxu0 %v320_v15  ;;  %354 = vmatpush3.bf16.msra.mxu1 %v320_v15 }
  0x23   :  { %325 = vmatprep.subr.bf16.mxu0 %v324_v20  ;;  %347 = vmatprep.subr.bf16.mxu1 %v324_v20 }
  0x26   :  { %327 = vmatpush3.bf16.msra.mxu0 %v324_v20  ;;  %355 = vmatpush3.bf16.msra.mxu1 %v324_v20 }
  0x27   :  { %329 = vmatprep.subr.bf16.mxu0 %v328_v23  ;;  %348 = vmatprep.subr.bf16.mxu1 %v328_v23 }
  0x2a   :  { %331 = vmatpush3.bf16.msra.mxu0 %v328_v23  ;;  %356 = vmatpush3.bf16.msra.mxu1 %v328_v23 }
  0x2b   :  { %333 = vmatprep.subr.bf16.mxu0 %v332_v26  ;;  %349 = vmatprep.subr.bf16.mxu1 %v332_v26 }
  0x2e   :  { %335 = vmatpush3.bf16.msra.mxu0 %v332_v26  ;;  %357 = vmatpush3.bf16.msra.mxu1 %v332_v26 }
  0x2f   :  { %337 = vmatprep.subr.bf16.mxu0 %v336_v29  ;;  %350 = vmatprep.subr.bf16.mxu1 %v336_v29 }
  0x32   :  { %339 = vmatpush3.bf16.msra.mxu0 %v336_v29  ;;  %358 = vmatpush3.bf16.msra.mxu1 %v336_v29 }
  0x33   :  { %341 = vmatprep.subr.bf16.mxu0 %v340_v32  ;;  %351 = vmatprep.subr.bf16.mxu1 %v340_v32 }
  0x36   :  { %343 = vmatpush3.bf16.msra.mxu0 %v340_v32  ;;  %359 = vmatpush3.bf16.msra.mxu1 %v340_v32 }
  0x94   :  { %v44_v35 = vpop.permute.xlu1 %43  ;;  %v38_v36 = vpop.permute.xlu0 %37 }
  0x95   :  { %vm60_vm0 = vcmp.eq.s32.totalorder %v27_v34, %v38_v36  ;;  %vm62_vm1 = vcmp.eq.s32.totalorder %v27_v34, %v44_v35 }
  0x96   :  { %300 = vmatprep.mubr.msk.f32.mxu0 %vm60_vm0, %v420_v37 }
  0x98   :  { %v47_v38 = vpop.permute.xlu1 %46  ;;  %v41_v39 = vpop.permute.xlu0 %40 }
  0x99   :  { %vm61_vm2 = vcmp.eq.s32.totalorder %v27_v34, %v41_v39  ;;  %vm63_vm3 = vcmp.eq.s32.totalorder %v27_v34, %v47_v38 }
  0x9a   :  { %301 = vmatmul.mubr.msk.f32.vlgmr.msra.gmra.mrb[0].mxu0 %vm61_vm2, %v420_v37 }
  0x9b   :  { %303 = vmatprep.mubr.msk.f32.mxu0 %vm62_vm1, %v420_v37 }
  0x9c   :  { %v53_v40 = vpop.permute.xlu1 %52  ;;  %v50_v41 = vpop.permute.xlu0 %49 }
  0x9d   :  { %vm65_vm4 = vcmp.eq.s32.totalorder %v27_v34, %v53_v40  ;;  %vm64_vm5 = vcmp.eq.s32.totalorder %v27_v34, %v50_v41 }
  0x9e   :  { %304 = vmatmul.mubr.msk.f32.gmra.mrb[2].mxu0 %vm63_vm3, %v420_v37  ;;  %306 = vmatprep.mubr.msk.f32.mxu1 %vm64_vm5, %v420_v37 }
  0x9f   :  { %307 = vmatmul.mubr.msk.f32.vlgmr.msra.gmra.mrb[0].mxu1 %vm65_vm4, %v420_v37 }
  0xa0   :  { %v59_v42 = vpop.permute.xlu1 %58  ;;  %v56_v43 = vpop.permute.xlu0 %55 }
  0xa1   :  { %vm67_vm6 = vcmp.eq.s32.totalorder %v27_v34, %v59_v42  ;;  %vm66_vm7 = vcmp.eq.s32.totalorder %v27_v34, %v56_v43 }
  0xa2   :  { %309 = vmatprep.mubr.msk.f32.mxu1 %vm66_vm7, %v420_v37 }
  0xa3   :  { %310 = vmatmul.mubr.msk.f32.gmra.mrb[2].mxu1 %vm67_vm6, %v420_v37 }
 0x16d   :  { %v302_v44 = vpop.f32.mrb[0].mxu0 }
 0x16e   :  { %v166_v45 = vpop.f32.mrb[1].mxu0 }
 0x16f   :  { %v205_v46 = vmax.f32 %v166_v45, %v302_v44 }
 0x171   :  { %v305_v47 = vpop.f32.mrb[2].mxu0 }
 0x172   :  { %v176_v48 = vpop.f32.mrb[3].mxu0  ;;  %v308_v49 = vpop.f32.mrb[0].mxu1 }
 0x173   :  { %v206_v50 = vmax.f32 %v205_v46, %v176_v48  ;;  %v186_v51 = vpop.f32.mrb[1].mxu1 }
 0x175   :  { %v207_v52 = vmax.f32 %v206_v50, %v305_v47 }
 0x176   :  { %v311_v53 = vpop.f32.mrb[2].mxu1 }
 0x177   :  { %v208_v54 = vmax.f32 %v207_v52, %v186_v51  ;;  %v196_v55 = vpop.f32.mrb[3].mxu1 }
 0x179   :  { %v209_v56 = vmax.f32 %v208_v54, %v308_v49 }
 0x17b   :  { %v210_v57 = vmax.f32 %v209_v56, %v196_v55 }
 0x17d   :  { %v211_v58 = vmax.f32 %v210_v57, %v311_v53 }
 0x17f   :  { %212 = vst [vmem:[#allocation5] sm:$0xff] %v211_v58 }
 0x180   :  { %401 = shalt.err (!%p398_p12)
}
 0x181   :  { %s402_s14 = scalar_lea.hbm %s487_s2, 128 }
 0x182   :  { %p403_p13 = scmp.ne.s32.totalorder %s487_s2, %s402_s14  ;;  %p406_p0 = scmp.lt.u32.totalorder %s402_s14, %s487_s2 }
 0x184   :  { %p408_p1 = pnand %p406_p0, %p403_p13 }
 0x186   :  { %411 = shalt.err (!%p408_p1)
}
 0x187   :  { %222 = dma.vmem_to_hbm [thread:$0]  %s220_s10, 128, %s487_s2, [#allocation4]  }
 0x188   :  { %414 = dma.done.wait [#allocation4], 128  }
 0x189   :  { %415 = vsyncadd [#allocation4], 4294967168 }
 0x18a   :  { %226 = vsyncpa [#allocation3], 1 }
 0x18b   :  { %227 = vsyncpa [#allocation4], 1 }

</bundles_post_ra>
